<compile_context>
chip_gen: v6e
topology: v6e:2x2x1
jax: 0.10.0
libtpu: 0.0.40
codegen_flags: <defaults>
</compile_context>

<pallas_src>
import functools
import math

import jax
import jax.numpy as jnp
from jax import lax
from jax.experimental import pallas as pl
from jax.experimental.pallas import tpu as pltpu


# ---------------------------------------------------------------------------
# Hardware-aware knobs
# ---------------------------------------------------------------------------
def _vmem_budget_and_tile_target():
    """(VMEM budget bytes, query-tile target) based on the TPU generation."""
    cap = None
    try:
        cap = getattr(pltpu.get_tpu_info(), "vmem_capacity_bytes", None)
    except Exception:
        cap = None
    if cap is None:
        cap = 64 * 1024 * 1024                       # conservative: v7x per-TC VMEM
    if cap <= 80 * 1024 * 1024:                      # v7x-class (64 MiB physical)
        return 48 * 1024 * 1024, 256
    return 100 * 1024 * 1024, 512                    # v5e / v6e (128 MiB physical)


def _eup_supports_bf16():
    """v6e/v7x EUP handles bf16 transcendentals; v2-v5 do not."""
    try:
        kind = jax.devices()[0].device_kind.lower()
    except Exception:
        return False
    return not any(t in kind for t in ("v2", "v3", "v4", "v5"))


# ---------------------------------------------------------------------------
# Stage 1: fused QKV projection (batch folded into M, single lane-dense store)
# ---------------------------------------------------------------------------
def _qkv_proj_kernel(x_ref, w_ref, b_ref, qkv_ref):
    # x_ref: (TM, D_in) f32; w_ref: (D_in, 3H) bf16; b_ref: (1, 3H) f32
    x = x_ref[...].astype(jnp.bfloat16)        # cast in-kernel (no extra HBM pass)
    qkv = jnp.dot(x, w_ref[...], preferred_element_type=jnp.float32) + b_ref[...]
    qkv_ref[...] = qkv.astype(qkv_ref.dtype)   # single fused (TM, 3H) store


# ---------------------------------------------------------------------------
# Stage 2: scaled dot-product attention over one (batch, query-tile) block
# ---------------------------------------------------------------------------
def _attention_kernel(q_ref, kv_ref, out_ref, attn_ref, *, hidden, exp_dtype):
    # q_ref : (TQ, 3H) bf16 — only the first H columns (pre-scaled Q) are used.
    # kv_ref: (S, 3H) bf16 — whole-sequence fused QKV block, one DMA per batch.
    h = hidden
    q = q_ref[...][:, :h]                                            # (TQ, H)
    kv = kv_ref[...]
    k = kv[:, h:2 * h]                                               # (S, H)
    v = kv[:, 2 * h:]                                                # (S, H)
    # energy = q @ k^T : contract on H — stays on the MXU, no XLU transpose.
    energy = lax.dot_general(q, k, (((1,), (1,)), ((), ())),
                             preferred_element_type=jnp.float32)     # (TQ, S) f32
    m = jnp.max(energy, axis=-1, keepdims=True)
    e = jnp.exp((energy - m).astype(exp_dtype))      # bf16 EUP on v6e/v7x, f32 on v5e
    l = jnp.sum(e.astype(jnp.float32), axis=-1, keepdims=True)
    r = pl.reciprocal(l, approx=False)               # exact softmax normalization
    # Normalize AFTER the PV matmul: (TQ, H) multiply instead of (TQ, S).
    pv = jnp.dot(e.astype(v.dtype), v, preferred_element_type=jnp.float32)  # (TQ, H)
    out_ref[...] = (pv * r).astype(out_ref.dtype)
    attn_ref[...] = (e.astype(jnp.float32) * r).astype(attn_ref.dtype)      # bf16 out


# ---------------------------------------------------------------------------
# Tiling / VMEM helpers
# ---------------------------------------------------------------------------
def _round_down8(x):
    return max(8, (x // 8) * 8)


def _proj_vmem_bytes(tm, d_in, threeh, weight_bufs):
    bf16, f32 = 2, 4
    est = (2 * (tm * d_in * f32 + tm * threeh * bf16)          # x / qkv blocks (x2)
           + weight_bufs * (d_in * threeh * bf16 + threeh * f32)
           + tm * threeh * f32)                                # f32 matmul temp
    return int(est * 1.25) + (2 << 20)                         # Mosaic scratch headroom


def _attn_vmem_bytes(tq, s, h):
    bf16, f32 = 2, 4
    threeh = 3 * h
    blocks = 2 * (tq * threeh * bf16                           # q block
                  + s * threeh * bf16                          # fused kv block
                  + tq * h * f32                               # out block
                  + tq * s * bf16)                             # attn block (bf16)
    scratch = 2 * tq * s * f32 + tq * h * f32                  # energy, e/attn, pv
    return int((blocks + scratch) * 1.25) + (2 << 20)          # Mosaic scratch headroom


# ---------------------------------------------------------------------------
# Wrapper
# ---------------------------------------------------------------------------
def local_attention(x, wq, bq, wk, bk, wv, bv, attn_dtype=jnp.bfloat16):
    """x: (B, S, D_in); wq/wk/wv: (D_in, H) (pre-transposed nn.Linear weights);
    bq/bk/bv: (H,).  Returns (out (B,S,H) f32, attention (B,S,S) attn_dtype)."""
    B, S, D_in = x.shape
    H = wq.shape[1]
    threeH = 3 * H
    inv_scale = 1.0 / math.sqrt(float(H))
    budget, tq_target = _vmem_budget_and_tile_target()
    exp_dtype = jnp.bfloat16 if _eup_supports_bf16() else jnp.float32

    # Fuse the three projections into one (D_in, 3H) weight / (1, 3H) bias and
    # fold 1/sqrt(H) into the Q columns (one-time weight prep, not per-token).
    wqkv = jnp.concatenate([wq * inv_scale, wk, wv], axis=1).astype(jnp.bfloat16)
    bqkv = jnp.concatenate([bq * inv_scale, bk, bv]).reshape(1, threeH).astype(jnp.float32)
    # TODO(synk): for very large D_in*3H the fused weight needs K/N grid tiling;
    # here it must fit VMEM as a single block.

    # ---- stage 1: fused QKV projection ------------------------------------
    M = B * S
    x2d = x.reshape(M, D_in)
    TM = M if M <= 512 else 512
    while TM > 8 and _proj_vmem_bytes(TM, D_in, threeH, 1) > budget:
        nxt = _round_down8(TM // 2)
        if nxt == TM:
            break
        TM = nxt

    def _stage1(single_buffer_weights):
        if single_buffer_weights:
            # Constant-index weight/bias blocks: no point double-buffering them.
            w_spec = pl.BlockSpec((D_in, threeH), lambda m: (0, 0),
                                  pipeline_mode=pl.Buffered(1))
            b_spec = pl.BlockSpec((1, threeH), lambda m: (0, 0),
                                  pipeline_mode=pl.Buffered(1))
            wbufs = 1
        else:
            w_spec = pl.BlockSpec((D_in, threeH), lambda m: (0, 0))
            b_spec = pl.BlockSpec((1, threeH), lambda m: (0, 0))
            wbufs = 2
        vmem_limit = int(min(budget, max(32 * 1024 * 1024,
                                         _proj_vmem_bytes(TM, D_in, threeH, wbufs))))
        return pl.pallas_call(
            _qkv_proj_kernel,
            out_shape=jax.ShapeDtypeStruct((M, threeH), jnp.bfloat16),
            grid_spec=pltpu.PrefetchScalarGridSpec(
                num_scalar_prefetch=0,
                grid=(pl.cdiv(M, TM),),          # TM need not divide M (edge masked)
                in_specs=[
                    pl.BlockSpec((TM, D_in), lambda m: (m, 0)),
                    w_spec,
                    b_spec,
                ],
                out_specs=pl.BlockSpec((TM, threeH), lambda m: (m, 0)),
            ),
            compiler_params=pltpu.CompilerParams(
                dimension_semantics=("parallel",),
                vmem_limit_bytes=vmem_limit),
            cost_estimate=pl.CostEstimate(
                flops=2 * M * D_in * threeH,
                transcendentals=0,
                bytes_accessed=M * D_in * 4 + D_in * threeH * 2 + M * threeH * 2),
        )(x2d, wqkv, bqkv)

    try:
        qkv2d = _stage1(single_buffer_weights=True)
    except Exception:
        # Older jax without Buffered(1) pipeline_mode support: fall back to the
        # default double-buffered constant blocks.
        qkv2d = _stage1(single_buffer_weights=False)

    qkv = qkv2d.reshape(B, S, threeH)   # contiguous leading-dim reshape: free

    # ---- stage 2: attention, grid = (batch, query tiles) -------------------
    # Keep B outer / qi inner so the whole-sequence fused block (index constant
    # across qi) is DMA'd once per batch, not once per query tile.
    TQ = S if S <= tq_target else tq_target
    while TQ > 8 and _attn_vmem_bytes(TQ, S, H) > budget:
        nxt = _round_down8(TQ // 2)
        if nxt == TQ:
            break
        TQ = nxt
    vmem_limit = int(min(budget, max(32 * 1024 * 1024, _attn_vmem_bytes(TQ, S, H))))

    q_spec = pl.BlockSpec((pl.Squeezed(), TQ, threeH), lambda b, qi: (b, qi, 0))
    kv_spec = pl.BlockSpec((pl.Squeezed(), S, threeH), lambda b, qi: (b, 0, 0))

    out, attn = pl.pallas_call(
        functools.partial(_attention_kernel, hidden=H, exp_dtype=exp_dtype),
        out_shape=(
            jax.ShapeDtypeStruct((B, S, H), jnp.float32),
            jax.ShapeDtypeStruct((B, S, S), attn_dtype),
        ),
        grid_spec=pltpu.PrefetchScalarGridSpec(
            num_scalar_prefetch=0,
            grid=(B, pl.cdiv(S, TQ)),        # TQ need not divide S (edge masked)
            in_specs=[q_spec, kv_spec],      # same fused array bound to both specs
            out_specs=[
                pl.BlockSpec((pl.Squeezed(), TQ, H), lambda b, qi: (b, qi, 0)),
                # attn block last dim = full key length S (lane-dense whenever S
                # is a multiple of 128); bf16 halves the dominant HBM writeback.
                pl.BlockSpec((pl.Squeezed(), TQ, S), lambda b, qi: (b, qi, 0)),
            ],
        ),
        compiler_params=pltpu.CompilerParams(
            dimension_semantics=("parallel", "parallel"),
            vmem_limit_bytes=vmem_limit),
        cost_estimate=pl.CostEstimate(
            flops=4 * B * S * S * H,
            transcendentals=B * S * S,
            bytes_accessed=(2 * B * S * threeH * 2 + B * S * H * 4
                            + B * S * S * jnp.dtype(attn_dtype).itemsize)),
    )(qkv, qkv)
    # TODO(synk): if downstream never consumes `attention`, drop the (B,S,S)
    # output and switch to an online-softmax (flash) structure over K tiles.
    return out, attn


def reference(x, wq, bq, wk, bk, wv, bv):
    H = wq.shape[1]
    q = x @ wq + bq
    k = x @ wk + bk
    v = x @ wv + bv
    energy = jnp.einsum("bqh,bkh->bqk", q, k) / jnp.sqrt(jnp.float32(H))
    attn = jax.nn.softmax(energy, axis=-1)
    return jnp.einsum("bqk,bkh->bqh", attn, v), attn


if __name__ == "__main__":
    B, S, D_IN, HIDDEN = 2, 8, 16, 32

    key = jax.random.PRNGKey(0)
    kx, kq, kbq, kk, kbk, kv, kbv = jax.random.split(key, 7)

    x = jax.random.normal(kx, (B, S, D_IN), dtype=jnp.float32)

    # nn.Linear(input_dim, hidden_dim): weight (H, D_in), bias (H,)
    # stored here pre-transposed as (D_in, H); deterministic uniform init.
    bound = 1.0 / math.sqrt(D_IN)
    wq = jax.random.uniform(kq, (D_IN, HIDDEN), jnp.float32, -bound, bound)
    bq = jax.random.uniform(kbq, (HIDDEN,), jnp.float32, -bound, bound)
    wk = jax.random.uniform(kk, (D_IN, HIDDEN), jnp.float32, -bound, bound)
    bk = jax.random.uniform(kbk, (HIDDEN,), jnp.float32, -bound, bound)
    wv = jax.random.uniform(kv, (D_IN, HIDDEN), jnp.float32, -bound, bound)
    bv = jax.random.uniform(kbv, (HIDDEN,), jnp.float32, -bound, bound)

    out, attn = local_attention(x, wq, bq, wk, bk, wv, bv)
    jax.block_until_ready((out, attn))

    out_ref, attn_ref = reference(x, wq, bq, wk, bk, wv, bv)
    assert out.shape == (B, S, HIDDEN) and attn.shape == (B, S, S)
    # bf16 MXU inputs (f32 accumulation) + bf16 attention output => ~1e-2 tol.
    assert jnp.allclose(out, out_ref, atol=2e-2, rtol=2e-2)
    assert jnp.allclose(attn.astype(jnp.float32), attn_ref, atol=2e-2, rtol=2e-2)

    print("KERNEL_OK")
</pallas_src>

<mosaic_0001>
module attributes {stable_mosaic.version = 11 : i64} {
  func.func @_qkv_proj_kernel(%arg0: i32, %arg1: memref<16x16xf32, #tpu.memory_space<vmem>>, %arg2: memref<16x96xbf16, #tpu.memory_space<vmem>>, %arg3: memref<1x96xf32, #tpu.memory_space<vmem>>, %arg4: memref<16x96xbf16, #tpu.memory_space<vmem>>) attributes {dimension_semantics = [#tpu.dimension_semantics<parallel>], iteration_bounds = array<i64: 1>, scalar_prefetch = 0 : i64, scratch_operands = 0 : i64, tpu.core_type = #tpu.core_type<tc>, window_params = [{transform_indices = @transform_0, window_bounds = array<i64: 16, 16>}, {pipeline_mode = #tpu.pipeline_mode<synchronous>, transform_indices = @transform_1, window_bounds = array<i64: 16, 96>}, {pipeline_mode = #tpu.pipeline_mode<synchronous>, transform_indices = @transform_2, window_bounds = array<i64: 1, 96>}, {transform_indices = @transform_3, window_bounds = array<i64: 16, 96>}]} {
    %c0 = arith.constant 0 : index
    %c0_0 = arith.constant 0 : index
    %0 = vector.load %arg1[%c0, %c0_0] : memref<16x16xf32, #tpu.memory_space<vmem>>, vector<16x16xf32>
    %1 = arith.truncf %0 : vector<16x16xf32> to vector<16x16xbf16>
    %c0_1 = arith.constant 0 : index
    %c0_2 = arith.constant 0 : index
    %2 = vector.load %arg2[%c0_1, %c0_2] : memref<16x96xbf16, #tpu.memory_space<vmem>>, vector<16x96xbf16>
    %cst = arith.constant dense<0.000000e+00> : vector<16x96xf32>
    %3 = tpu.matmul %1, %2, %cst {dimension_numbers = #tpu.dot_dimension_numbers<[1], [0], [0], [1], [0, 0, 1, 1], [], []>} : vector<16x16xbf16>, vector<16x96xbf16>, vector<16x96xf32> -> vector<16x96xf32>
    %c0_3 = arith.constant 0 : index
    %c0_4 = arith.constant 0 : index
    %4 = vector.load %arg3[%c0_3, %c0_4] : memref<1x96xf32, #tpu.memory_space<vmem>>, vector<1x96xf32>
    %5 = vector.broadcast %4 : vector<1x96xf32> to vector<16x96xf32>
    %6 = arith.addf %3, %5 : vector<16x96xf32>
    %7 = arith.truncf %6 : vector<16x96xf32> to vector<16x96xbf16>
    %c0_5 = arith.constant 0 : index
    %c0_6 = arith.constant 0 : index
    %8 = vector.load %arg4[%c0_5, %c0_6] : memref<16x96xbf16, #tpu.memory_space<vmem>>, vector<16x96xbf16>
    tpu.vector_store %arg4[%c0_5, %c0_6], %7 {strides = array<i32>} : memref<16x96xbf16, #tpu.memory_space<vmem>>, vector<16x96xbf16>,
    return
  }
  func.func @transform_0(%arg0: i32) -> (i32, i32) {
    %c0_i32 = arith.constant 0 : i32
    %c0_i32_0 = arith.constant 0 : i32
    return %arg0, %c0_i32 : i32, i32
  }
  func.func @transform_1(%arg0: i32) -> (i32, i32) {
    %c0_i32 = arith.constant 0 : i32
    %c0_i32_0 = arith.constant 0 : i32
    %c0_i32_1 = arith.constant 0 : i32
    return %c0_i32, %c0_i32_0 : i32, i32
  }
  func.func @transform_2(%arg0: i32) -> (i32, i32) {
    %c0_i32 = arith.constant 0 : i32
    %c0_i32_0 = arith.constant 0 : i32
    %c0_i32_1 = arith.constant 0 : i32
    return %c0_i32, %c0_i32_0 : i32, i32
  }
  func.func @transform_3(%arg0: i32) -> (i32, i32) {
    %c0_i32 = arith.constant 0 : i32
    %c0_i32_0 = arith.constant 0 : i32
    return %arg0, %c0_i32 : i32, i32
  }
}

module attributes {stable_mosaic.version = 11 : i64} {
  func.func @_qkv_proj_kernel(%arg0: i32, %arg1: memref<16x16xf32, #tpu.memory_space<vmem>>, %arg2: memref<16x96xbf16, #tpu.memory_space<vmem>>, %arg3: memref<1x96xf32, #tpu.memory_space<vmem>>, %arg4: memref<16x96xbf16, #tpu.memory_space<vmem>>) attributes {dimension_semantics = [#tpu.dimension_semantics<parallel>], iteration_bounds = array<i64: 1>, scalar_prefetch = 0 : i64, scratch_operands = 0 : i64, tpu.core_type = #tpu.core_type<tc>, window_params = [{transform_indices = @transform_0, window_bounds = array<i64: 16, 16>}, {pipeline_mode = #tpu.pipeline_mode<synchronous>, transform_indices = @transform_1, window_bounds = array<i64: 16, 96>}, {pipeline_mode = #tpu.pipeline_mode<synchronous>, transform_indices = @transform_2, window_bounds = array<i64: 1, 96>}, {transform_indices = @transform_3, window_bounds = array<i64: 16, 96>}]} {
    %c0 = arith.constant 0 : index
    %c0_0 = arith.constant 0 : index
    %0 = vector.load %arg1[%c0, %c0_0] : memref<16x16xf32, #tpu.memory_space<vmem>>, vector<16x16xf32>
    %1 = arith.truncf %0 : vector<16x16xf32> to vector<16x16xbf16>
    %c0_1 = arith.constant 0 : index
    %c0_2 = arith.constant 0 : index
    %2 = vector.load %arg2[%c0_1, %c0_2] : memref<16x96xbf16, #tpu.memory_space<vmem>>, vector<16x96xbf16>
    %cst = arith.constant dense<0.000000e+00> : vector<16x96xf32>
    %3 = tpu.matmul %1, %2, %cst {dimension_numbers = #tpu.dot_dimension_numbers<[1], [0], [0], [1], [0, 0, 1, 1], [], []>} : vector<16x16xbf16>, vector<16x96xbf16>, vector<16x96xf32> -> vector<16x96xf32>
    %c0_3 = arith.constant 0 : index
    %c0_4 = arith.constant 0 : index
    %4 = vector.load %arg3[%c0_3, %c0_4] : memref<1x96xf32, #tpu.memory_space<vmem>>, vector<1x96xf32>
    %5 = vector.broadcast %4 : vector<1x96xf32> to vector<16x96xf32>
    %6 = arith.addf %3, %5 : vector<16x96xf32>
    %7 = arith.truncf %6 : vector<16x96xf32> to vector<16x96xbf16>
    %c0_5 = arith.constant 0 : index
    %c0_6 = arith.constant 0 : index
    %8 = vector.load %arg4[%c0_5, %c0_6] : memref<16x96xbf16, #tpu.memory_space<vmem>>, vector<16x96xbf16>
    tpu.vector_store %arg4[%c0_5, %c0_6], %7 {strides = array<i32>} : memref<16x96xbf16, #tpu.memory_space<vmem>>, vector<16x96xbf16>,
    return
  }
  func.func @transform_0(%arg0: i32) -> (i32, i32) {
    %c0_i32 = arith.constant 0 : i32
    %c0_i32_0 = arith.constant 0 : i32
    return %arg0, %c0_i32 : i32, i32
  }
  func.func @transform_1(%arg0: i32) -> (i32, i32) {
    %c0_i32 = arith.constant 0 : i32
    %c0_i32_0 = arith.constant 0 : i32
    %c0_i32_1 = arith.constant 0 : i32
    return %c0_i32, %c0_i32_0 : i32, i32
  }
  func.func @transform_2(%arg0: i32) -> (i32, i32) {
    %c0_i32 = arith.constant 0 : i32
    %c0_i32_0 = arith.constant 0 : i32
    %c0_i32_1 = arith.constant 0 : i32
    return %c0_i32, %c0_i32_0 : i32, i32
  }
  func.func @transform_3(%arg0: i32) -> (i32, i32) {
    %c0_i32 = arith.constant 0 : i32
    %c0_i32_0 = arith.constant 0 : i32
    return %arg0, %c0_i32 : i32, i32
  }
}

</mosaic_0001>

<bundles_post_ra>
// kernel: tpu_custom_call.1
= control target key start
LH: loop header
LB: loop body
LE: loop exit
PB: predicated region body
PF: predicated region fallthrough
CT: control target
= control target key end

     0   :  { %8 = vsyncpa [#allocation3], 0  ;;  %s274_s0 = inlined_call_operand.hbm [shape: f32[16,16], index: 0, kind: input, shape index: {}]   ;;  %s275_s1 = inlined_call_operand.hbm [shape: bf16[16,96], index: 1, kind: input, shape index: {}]   ;;  %s276_s2 = inlined_call_operand.vmem [shape: f32[1,96], index: 2, kind: input, shape index: {}]   ;;  %s277_s3 = inlined_call_operand.hbm [shape: bf16[16,96], index: 3, kind: output, shape index: {}]  }
   0x1   :  { %9 = vsyncpa [#allocation6], 0 }
   0x2   :  { %10 = vsyncpa [#allocation4], 0  ;;  %s227_s12 = smov [#allocation2]  }
   0x3   :  { %s16_s13 = sshll.u32 %s227_s12, 4  ;;  %s17_s13 = int_to_ptr.vmem [resolvable:$true] %s16_s13 }
   0x4   :  { %s169_s14 = scalar_lea.vmem %s17_s13, 256  ;;  %p174_p1 = scmp.lt.s32.totalorder %s17_s13, %s17_s13 }
   0x5   :  { %p170_p0 = scmp.ne.s32.totalorder %s17_s13, %s169_s14  ;;  %p175_p2 = scmp.lt.s32.totalorder %s169_s14, %s169_s14 }
   0x7   :  { %p176_p3 = por %p175_p2, %p174_p1 }
   0x9   :  { %p177_p4 = pnand %p176_p3, %p170_p0 }
   0xb   :  { %180 = shalt.err (!%p177_p4)
}
   0xc   :  { %s228_s15 = smov 128   ;;  %s229_s16 = smov 8  }
   0xd   :  { %22 = dma.hbm_to_vmem [thread:$0]  %s274_s0, 256, %s17_s13, [#allocation3], %s228_s15, %s228_s15, %s229_s16  }
   0xe   :  { %s230_s19 = smov [#allocation5]  }
   0xf   :  { %s28_s20 = sshll.u32 %s230_s19, 4  ;;  %s29_s20 = int_to_ptr.vmem [resolvable:$true] %s28_s20 }
  0x10   :  { %s189_s21 = scalar_lea.vmem %s29_s20, 128  ;;  %p194_p6 = scmp.lt.s32.totalorder %s29_s20, %s29_s20 }
  0x11   :  { %p190_p5 = scmp.ne.s32.totalorder %s29_s20, %s189_s21  ;;  %p195_p7 = scmp.lt.s32.totalorder %s189_s21, %s189_s21 }
  0x13   :  { %p196_p8 = por %p195_p7, %p194_p6 }
  0x15   :  { %p197_p9 = pnand %p196_p8, %p190_p5 }
  0x17   :  { %200 = shalt.err (!%p197_p9)
}
  0x18   :  { %s231_s22 = smov 64   ;;  %s232_s23 = smov 4  }
  0x19   :  { %34 = dma.hbm_to_vmem [thread:$0]  %s275_s1, 128, %s29_s20, [#allocation6], %s231_s22, %s231_s22, %s232_s23  }
  0x1a   :  { %221 = dma.done.wait [#allocation3], 256  }
  0x1b   :  { %222 = vsyncadd [#allocation3], 4294967040 }
  0x1c   :  { %223 = dma.done.wait [#allocation6], 128  }
  0x1d   :  { %224 = vsyncadd [#allocation6], 4294967168  ;;  %v233_v0 = vmov 0.0   ;;  %vm234_vm0 = vmmov 0   ;;  %v160_v1 = vld [vmem:[#allocation5] sm:$0xff]   ;;  %v44_v2 = vld [vmem:[#allocation2] sm:$0xff] }
  0x1e   :  { %145 = vmatprep.subr.bf16.mxu0 %v233_v0  ;;  %147 = vmatprep.mubr.msk.bf16.mxu0 %vm234_vm0, %v233_v0  ;;  %v45_v3 = vld [vmem:[#allocation2 + $0x8] sm:$0xff]  ;;  %vm62_vm1 = vcmask 130048   ;;  %v136_v5 = vld [vmem:[%s276_s2] ss:$0 sm:$0xff]  ;;  %vm115_vm2 = vcmask 781312   ;;  %s235_s1 = smov [#allocation7]  }
  0x1f   :  { %146 = vmatpush3.bf16.msra.mxu0 %v160_v1  ;;  %v46_v4 = vpack.c.bf16 %v45_v3, %v44_v2  ;;  %s123_s27 = sshll.u32 %s235_s1, 4  ;;  %s124_s27 = int_to_ptr.vmem [resolvable:$true] %s123_s27 }
  0x20   :  { %s201_s28 = scalar_lea.vmem %s124_s27, 128  ;;  %p206_p11 = scmp.lt.s32.totalorder %s124_s27, %s124_s27 }
  0x21   :  { %p202_p10 = scmp.ne.s32.totalorder %s124_s27, %s201_s28  ;;  %p207_p12 = scmp.lt.s32.totalorder %s201_s28, %s201_s28 }
  0x22   :  { %148 = vmatmul.mubr.msk.bf16.vlgmr.msra.gmra.mxu0 %vm62_vm1, %v46_v4 }
  0x23   :  { %p208_p13 = por %p207_p12, %p206_p11 }
  0x25   :  { %p209_p0 = pnand %p208_p13, %p202_p10 }
  0xe2   :  { %v100_v6 = vpop.f32.mrf.mxu0 }
  0xe3   :  { %v101_v7 = vadd.f32 %v136_v5, %v100_v6 }
  0xe4   :  { %v149_v8 = vpop.f32.mrf.mxu0 }
  0xe5   :  { %v141_v9 = vpack.c.bf16 %v101_v7, %v101_v7 }
  0xe6   :  { %v103_v10 = vpop.f32.mrf.mxu0 }
  0xe7   :  { %v104_v11 = vadd.f32 %v136_v5, %v103_v10  ;;  %116 = vst.msk [vmem:[#allocation7] sm:$0xf] %vm115_vm2, %v141_v9 }
  0xe8   :  { %v150_v12 = vpop.f32.mrf.mxu0 }
  0xe9   :  { %v142_v13 = vpack.c.bf16 %v104_v11, %v104_v11 }
  0xeb   :  { %117 = vst.msk [vmem:[#allocation7 + $0x4] sm:$0xf] %vm115_vm2, %v142_v13 }
  0xec   :  { %212 = shalt.err (!%p209_p0)
}
  0xed   :  { %129 = dma.vmem_to_hbm [thread:$0]  %s124_s27, 128, %s277_s3, [#allocation4], %s231_s22, %s231_s22, %s232_s23  }
  0xee   :  { %225 = dma.done.wait [#allocation4], 128  }
  0xef   :  { %226 = vsyncadd [#allocation4], 4294967168 }
  0xf0   :  { %133 = vsyncpa [#allocation3], 1 }
  0xf1   :  { %134 = vsyncpa [#allocation6], 1 }
  0xf2   :  { %135 = vsyncpa [#allocation4], 1 }

// kernel: tpu_custom_call.1
= control target key start
LH: loop header
LB: loop body
LE: loop exit
PB: predicated region body
PF: predicated region fallthrough
CT: control target
= control target key end

     0   :  { %8 = vsyncpa [#allocation3], 0  ;;  %s274_s0 = inlined_call_operand.hbm [shape: f32[16,16], index: 0, kind: input, shape index: {}]   ;;  %s275_s1 = inlined_call_operand.hbm [shape: bf16[16,96], index: 1, kind: input, shape index: {}]   ;;  %s276_s2 = inlined_call_operand.vmem [shape: f32[1,96], index: 2, kind: input, shape index: {}]   ;;  %s277_s3 = inlined_call_operand.hbm [shape: bf16[16,96], index: 3, kind: output, shape index: {}]  }
   0x1   :  { %9 = vsyncpa [#allocation6], 0 }
   0x2   :  { %10 = vsyncpa [#allocation4], 0  ;;  %s227_s12 = smov [#allocation2]  }
   0x3   :  { %s16_s13 = sshll.u32 %s227_s12, 4  ;;  %s17_s13 = int_to_ptr.vmem [resolvable:$true] %s16_s13 }
   0x4   :  { %s169_s14 = scalar_lea.vmem %s17_s13, 256  ;;  %p174_p1 = scmp.lt.s32.totalorder %s17_s13, %s17_s13 }
   0x5   :  { %p170_p0 = scmp.ne.s32.totalorder %s17_s13, %s169_s14  ;;  %p175_p2 = scmp.lt.s32.totalorder %s169_s14, %s169_s14 }
   0x7   :  { %p176_p3 = por %p175_p2, %p174_p1 }
   0x9   :  { %p177_p4 = pnand %p176_p3, %p170_p0 }
   0xb   :  { %180 = shalt.err (!%p177_p4)
}
   0xc   :  { %s228_s15 = smov 128   ;;  %s229_s16 = smov 8  }
   0xd   :  { %22 = dma.hbm_to_vmem [thread:$0]  %s274_s0, 256, %s17_s13, [#allocation3], %s228_s15, %s228_s15, %s229_s16  }
   0xe   :  { %s230_s19 = smov [#allocation5]  }
   0xf   :  { %s28_s20 = sshll.u32 %s230_s19, 4  ;;  %s29_s20 = int_to_ptr.vmem [resolvable:$true] %s28_s20 }
  0x10   :  { %s189_s21 = scalar_lea.vmem %s29_s20, 128  ;;  %p194_p6 = scmp.lt.s32.totalorder %s29_s20, %s29_s20 }
  0x11   :  { %p190_p5 = scmp.ne.s32.totalorder %s29_s20, %s189_s21  ;;  %p195_p7 = scmp.lt.s32.totalorder %s189_s21, %s189_s21 }
  0x13   :  { %p196_p8 = por %p195_p7, %p194_p6 }
  0x15   :  { %p197_p9 = pnand %p196_p8, %p190_p5 }
  0x17   :  { %200 = shalt.err (!%p197_p9)
}
  0x18   :  { %s231_s22 = smov 64   ;;  %s232_s23 = smov 4  }
  0x19   :  { %34 = dma.hbm_to_vmem [thread:$0]  %s275_s1, 128, %s29_s20, [#allocation6], %s231_s22, %s231_s22, %s232_s23  }
  0x1a   :  { %221 = dma.done.wait [#allocation3], 256  }
  0x1b   :  { %222 = vsyncadd [#allocation3], 4294967040 }
  0x1c   :  { %223 = dma.done.wait [#allocation6], 128  }
  0x1d   :  { %224 = vsyncadd [#allocation6], 4294967168  ;;  %v233_v0 = vmov 0.0   ;;  %vm234_vm0 = vmmov 0   ;;  %v160_v1 = vld [vmem:[#allocation5] sm:$0xff]   ;;  %v44_v2 = vld [vmem:[#allocation2] sm:$0xff] }
  0x1e   :  { %145 = vmatprep.subr.bf16.mxu0 %v233_v0  ;;  %147 = vmatprep.mubr.msk.bf16.mxu0 %vm234_vm0, %v233_v0  ;;  %v45_v3 = vld [vmem:[#allocation2 + $0x8] sm:$0xff]  ;;  %vm62_vm1 = vcmask 130048   ;;  %v136_v5 = vld [vmem:[%s276_s2] ss:$0 sm:$0xff]  ;;  %vm115_vm2 = vcmask 781312   ;;  %s235_s1 = smov [#allocation7]  }
  0x1f   :  { %146 = vmatpush3.bf16.msra.mxu0 %v160_v1  ;;  %v46_v4 = vpack.c.bf16 %v45_v3, %v44_v2  ;;  %s123_s27 = sshll.u32 %s235_s1, 4  ;;  %s124_s27 = int_to_ptr.vmem [resolvable:$true] %s123_s27 }
  0x20   :  { %s201_s28 = scalar_lea.vmem %s124_s27, 128  ;;  %p206_p11 = scmp.lt.s32.totalorder %s124_s27, %s124_s27 }
  0x21   :  { %p202_p10 = scmp.ne.s32.totalorder %s124_s27, %s201_s28  ;;  %p207_p12 = scmp.lt.s32.totalorder %s201_s28, %s201_s28 }
  0x22   :  { %148 = vmatmul.mubr.msk.bf16.vlgmr.msra.gmra.mxu0 %vm62_vm1, %v46_v4 }
  0x23   :  { %p208_p13 = por %p207_p12, %p206_p11 }
  0x25   :  { %p209_p0 = pnand %p208_p13, %p202_p10 }
  0xe2   :  { %v100_v6 = vpop.f32.mrf.mxu0 }
  0xe3   :  { %v101_v7 = vadd.f32 %v136_v5, %v100_v6 }
  0xe4   :  { %v149_v8 = vpop.f32.mrf.mxu0 }
  0xe5   :  { %v141_v9 = vpack.c.bf16 %v101_v7, %v101_v7 }
  0xe6   :  { %v103_v10 = vpop.f32.mrf.mxu0 }
  0xe7   :  { %v104_v11 = vadd.f32 %v136_v5, %v103_v10  ;;  %116 = vst.msk [vmem:[#allocation7] sm:$0xf] %vm115_vm2, %v141_v9 }
  0xe8   :  { %v150_v12 = vpop.f32.mrf.mxu0 }
  0xe9   :  { %v142_v13 = vpack.c.bf16 %v104_v11, %v104_v11 }
  0xeb   :  { %117 = vst.msk [vmem:[#allocation7 + $0x4] sm:$0xf] %vm115_vm2, %v142_v13 }
  0xec   :  { %212 = shalt.err (!%p209_p0)
}
  0xed   :  { %129 = dma.vmem_to_hbm [thread:$0]  %s124_s27, 128, %s277_s3, [#allocation4], %s231_s22, %s231_s22, %s232_s23  }
  0xee   :  { %225 = dma.done.wait [#allocation4], 128  }
  0xef   :  { %226 = vsyncadd [#allocation4], 4294967168 }
  0xf0   :  { %133 = vsyncpa [#allocation3], 1 }
  0xf1   :  { %134 = vsyncpa [#allocation6], 1 }
  0xf2   :  { %135 = vsyncpa [#allocation4], 1 }

</bundles_post_ra>
